<compile_context>
chip_gen: v5e
topology: v5e:2x2
jax: 0.10.0
libtpu: 0.0.40
codegen_flags: <defaults>
</compile_context>

<pallas_src>
import math

import jax
import jax.numpy as jnp
from jax.experimental import pallas as pl
from jax.experimental.pallas import tpu as pltpu


# ----------------------------- Pallas kernel ---------------------------------

def decoder_kernel(x_ref, w1_ref, b1_ref, g1_ref, bt1_ref,
                   w2_ref, b2_ref, g2_ref, bt2_ref,
                   w3_ref, b3_ref, o_ref):
    f32 = jnp.float32
    inv_sqrt2 = 1.0 / math.sqrt(2.0)

    def layernorm(y, gamma, beta):
        # PyTorch LayerNorm: biased variance, eps=1e-5, elementwise affine.
        mean = jnp.mean(y, axis=-1, keepdims=True)
        var = jnp.mean((y - mean) ** 2, axis=-1, keepdims=True)
        return (y - mean) * jax.lax.rsqrt(var + 1e-5) * gamma + beta

    def gelu(y):
        # Exact (erf-based) GELU, matching nn.GELU() default.
        return 0.5 * y * (1.0 + jax.lax.erf(y * inv_sqrt2))

    x = x_ref[...].astype(f32)                                               # (B, S*D)

    h = jnp.dot(x, w1_ref[...], preferred_element_type=f32) + b1_ref[...]    # (B, 5*D)
    h = gelu(layernorm(h, g1_ref[...], bt1_ref[...]))

    h = jnp.dot(h, w2_ref[...], preferred_element_type=f32) + b2_ref[...]    # (B, 10)
    h = gelu(layernorm(h, g2_ref[...], bt2_ref[...]))

    out = jnp.dot(h, w3_ref[...], preferred_element_type=f32) + b3_ref[...]  # (B, 2)
    o_ref[...] = out.astype(o_ref.dtype)


# ------------------------------ wrapper ---------------------------------------

def decoder_forward(x, params):
    B, S, D = x.shape
    # Flatten in the wrapper (same row-major semantics as torch .reshape(B, S*D)).
    x2 = x.reshape(B, S * D)

    vmem = lambda: pl.BlockSpec(memory_space=pltpu.MemorySpace.VMEM)

    return pl.pallas_call(
        decoder_kernel,
        out_shape=jax.ShapeDtypeStruct((B, 2), x.dtype),
        in_specs=[vmem() for _ in range(11)],
        out_specs=vmem(),
    )(x2,
      params["w1"], params["b1"], params["g1"], params["bt1"],
      params["w2"], params["b2"], params["g2"], params["bt2"],
      params["w3"], params["b3"])


# --------------------------- reference (plain JAX) ----------------------------

def reference(x, p):
    B, S, D = x.shape
    y = x.reshape(B, S * D)

    def layernorm(v, gamma, beta):
        mean = jnp.mean(v, axis=-1, keepdims=True)
        var = jnp.mean((v - mean) ** 2, axis=-1, keepdims=True)
        return (v - mean) / jnp.sqrt(var + 1e-5) * gamma + beta

    y = y @ p["w1"] + p["b1"]
    y = jax.nn.gelu(layernorm(y, p["g1"], p["bt1"]), approximate=False)
    y = y @ p["w2"] + p["b2"]
    y = jax.nn.gelu(layernorm(y, p["g2"], p["bt2"]), approximate=False)
    y = y @ p["w3"] + p["b3"]
    return y


# ------------------------------- params ---------------------------------------

def init_params(key, S, D):
    SD = S * D
    D5 = D * 5

    def lin(key, fan_in, fan_out):
        kw, kb = jax.random.split(key)
        bound = 1.0 / math.sqrt(fan_in)
        w = jax.random.uniform(kw, (fan_in, fan_out), jnp.float32, -bound, bound)
        b = jax.random.uniform(kb, (1, fan_out), jnp.float32, -bound, bound)
        return w, b

    k1, k2, k3 = jax.random.split(key, 3)
    w1, b1 = lin(k1, SD, D5)      # linear1: S*D -> 5*D
    w2, b2 = lin(k2, D5, 10)      # linear2: 5*D -> 10
    w3, b3 = lin(k3, 10, 2)       # out:     10  -> 2
    return dict(
        w1=w1, b1=b1, g1=jnp.ones((1, D5), jnp.float32), bt1=jnp.zeros((1, D5), jnp.float32),
        w2=w2, b2=b2, g2=jnp.ones((1, 10), jnp.float32), bt2=jnp.zeros((1, 10), jnp.float32),
        w3=w3, b3=b3)


# ------------------------------- main -----------------------------------------

if __name__ == "__main__":
    B, S, D = 2, 8, 32   # batch, seq_length, input_dim

    key = jax.random.PRNGKey(0)
    kx, kp = jax.random.split(key)
    x = jax.random.normal(kx, (B, S, D), jnp.float32)
    params = init_params(kp, S, D)

    out = decoder_forward(x, params)
    out = jax.block_until_ready(out)

    ref = reference(x, params)
    assert out.shape == (B, 2)
    assert jnp.allclose(out, ref, atol=1e-4, rtol=1e-4), \
        f"max abs err = {jnp.max(jnp.abs(out - ref))}"

    print("KERNEL_OK")
</pallas_src>

<mosaic_0001>
module attributes {stable_mosaic.version = 11 : i64} {
  func.func @decoder_kernel(%arg0: memref<2x256xf32, #tpu.memory_space<vmem>>, %arg1: memref<256x160xf32, #tpu.memory_space<vmem>>, %arg2: memref<1x160xf32, #tpu.memory_space<vmem>>, %arg3: memref<1x160xf32, #tpu.memory_space<vmem>>, %arg4: memref<1x160xf32, #tpu.memory_space<vmem>>, %arg5: memref<160x10xf32, #tpu.memory_space<vmem>>, %arg6: memref<1x10xf32, #tpu.memory_space<vmem>>, %arg7: memref<1x10xf32, #tpu.memory_space<vmem>>, %arg8: memref<1x10xf32, #tpu.memory_space<vmem>>, %arg9: memref<10x2xf32, #tpu.memory_space<vmem>>, %arg10: memref<1x2xf32, #tpu.memory_space<vmem>>, %arg11: memref<2x2xf32, #tpu.memory_space<vmem>>) attributes {dimension_semantics = [], scalar_prefetch = 0 : i64, scratch_operands = 0 : i64, tpu.core_type = #tpu.core_type<tc>} {
    %c0 = arith.constant 0 : index
    %c0_0 = arith.constant 0 : index
    %0 = vector.load %arg0[%c0, %c0_0] : memref<2x256xf32, #tpu.memory_space<vmem>>, vector<2x256xf32>
    %c0_1 = arith.constant 0 : index
    %c0_2 = arith.constant 0 : index
    %1 = vector.load %arg1[%c0_1, %c0_2] : memref<256x160xf32, #tpu.memory_space<vmem>>, vector<256x160xf32>
    %cst = arith.constant dense<0.000000e+00> : vector<2x160xf32>
    %2 = tpu.matmul %0, %1, %cst {dimension_numbers = #tpu.dot_dimension_numbers<[1], [0], [0], [1], [0, 0, 1, 1], [], []>} : vector<2x256xf32>, vector<256x160xf32>, vector<2x160xf32> -> vector<2x160xf32>
    %c0_3 = arith.constant 0 : index
    %c0_4 = arith.constant 0 : index
    %3 = vector.load %arg2[%c0_3, %c0_4] : memref<1x160xf32, #tpu.memory_space<vmem>>, vector<1x160xf32>
    %4 = vector.broadcast %3 : vector<1x160xf32> to vector<2x160xf32>
    %5 = arith.addf %2, %4 : vector<2x160xf32>
    %c0_5 = arith.constant 0 : index
    %c0_6 = arith.constant 0 : index
    %6 = vector.load %arg3[%c0_5, %c0_6] : memref<1x160xf32, #tpu.memory_space<vmem>>, vector<1x160xf32>
    %c0_7 = arith.constant 0 : index
    %c0_8 = arith.constant 0 : index
    %7 = vector.load %arg4[%c0_7, %c0_8] : memref<1x160xf32, #tpu.memory_space<vmem>>, vector<1x160xf32>
    %cst_9 = arith.constant dense<0.000000e+00> : vector<2xf32>
    %8 = vector.multi_reduction <add>, %5, %cst_9 [1] : vector<2x160xf32> to vector<2xf32>
    %9 = vector.shape_cast %8 : vector<2xf32> to vector<2x1xf32>
    %cst_10 = arith.constant 1.600000e+02 : f32
    %10 = vector.broadcast %cst_10 : f32 to vector<2x1xf32>
    %11 = arith.divf %9, %10 : vector<2x1xf32>
    %12 = vector.broadcast %11 : vector<2x1xf32> to vector<2x160xf32>
    %13 = arith.subf %5, %12 : vector<2x160xf32>
    %14 = arith.mulf %13, %13 : vector<2x160xf32>
    %cst_11 = arith.constant dense<0.000000e+00> : vector<2xf32>
    %15 = vector.multi_reduction <add>, %14, %cst_11 [1] : vector<2x160xf32> to vector<2xf32>
    %16 = vector.shape_cast %15 : vector<2xf32> to vector<2x1xf32>
    %cst_12 = arith.constant 1.600000e+02 : f32
    %17 = vector.broadcast %cst_12 : f32 to vector<2x1xf32>
    %18 = arith.divf %16, %17 : vector<2x1xf32>
    %19 = vector.broadcast %11 : vector<2x1xf32> to vector<2x160xf32>
    %20 = arith.subf %5, %19 : vector<2x160xf32>
    %cst_13 = arith.constant 9.99999974E-6 : f32
    %21 = vector.broadcast %cst_13 : f32 to vector<2x1xf32>
    %22 = arith.addf %18, %21 : vector<2x1xf32>
    %23 = math.rsqrt %22 : vector<2x1xf32>
    %24 = vector.broadcast %23 : vector<2x1xf32> to vector<2x160xf32>
    %25 = arith.mulf %20, %24 : vector<2x160xf32>
    %26 = vector.broadcast %6 : vector<1x160xf32> to vector<2x160xf32>
    %27 = arith.mulf %25, %26 : vector<2x160xf32>
    %28 = vector.broadcast %7 : vector<1x160xf32> to vector<2x160xf32>
    %29 = arith.addf %27, %28 : vector<2x160xf32>
    %cst_14 = arith.constant 5.000000e-01 : f32
    %30 = vector.broadcast %cst_14 : f32 to vector<2x160xf32>
    %31 = arith.mulf %30, %29 : vector<2x160xf32>
    %cst_15 = arith.constant 0.707106769 : f32
    %32 = vector.broadcast %cst_15 : f32 to vector<2x160xf32>
    %33 = arith.mulf %29, %32 : vector<2x160xf32>
    %34 = math.erf %33 : vector<2x160xf32>
    %cst_16 = arith.constant 1.000000e+00 : f32
    %35 = vector.broadcast %cst_16 : f32 to vector<2x160xf32>
    %36 = arith.addf %35, %34 : vector<2x160xf32>
    %37 = arith.mulf %31, %36 : vector<2x160xf32>
    %c0_17 = arith.constant 0 : index
    %c0_18 = arith.constant 0 : index
    %38 = vector.load %arg5[%c0_17, %c0_18] : memref<160x10xf32, #tpu.memory_space<vmem>>, vector<160x10xf32>
    %cst_19 = arith.constant dense<0.000000e+00> : vector<2x10xf32>
    %39 = tpu.matmul %37, %38, %cst_19 {dimension_numbers = #tpu.dot_dimension_numbers<[1], [0], [0], [1], [0, 0, 1, 1], [], []>} : vector<2x160xf32>, vector<160x10xf32>, vector<2x10xf32> -> vector<2x10xf32>
    %c0_20 = arith.constant 0 : index
    %c0_21 = arith.constant 0 : index
    %40 = vector.load %arg6[%c0_20, %c0_21] : memref<1x10xf32, #tpu.memory_space<vmem>>, vector<1x10xf32>
    %41 = vector.broadcast %40 : vector<1x10xf32> to vector<2x10xf32>
    %42 = arith.addf %39, %41 : vector<2x10xf32>
    %c0_22 = arith.constant 0 : index
    %c0_23 = arith.constant 0 : index
    %43 = vector.load %arg7[%c0_22, %c0_23] : memref<1x10xf32, #tpu.memory_space<vmem>>, vector<1x10xf32>
    %c0_24 = arith.constant 0 : index
    %c0_25 = arith.constant 0 : index
    %44 = vector.load %arg8[%c0_24, %c0_25] : memref<1x10xf32, #tpu.memory_space<vmem>>, vector<1x10xf32>
    %cst_26 = arith.constant dense<0.000000e+00> : vector<2xf32>
    %45 = vector.multi_reduction <add>, %42, %cst_26 [1] : vector<2x10xf32> to vector<2xf32>
    %46 = vector.shape_cast %45 : vector<2xf32> to vector<2x1xf32>
    %cst_27 = arith.constant 1.000000e+01 : f32
    %47 = vector.broadcast %cst_27 : f32 to vector<2x1xf32>
    %48 = arith.divf %46, %47 : vector<2x1xf32>
    %49 = vector.broadcast %48 : vector<2x1xf32> to vector<2x10xf32>
    %50 = arith.subf %42, %49 : vector<2x10xf32>
    %51 = arith.mulf %50, %50 : vector<2x10xf32>
    %cst_28 = arith.constant dense<0.000000e+00> : vector<2xf32>
    %52 = vector.multi_reduction <add>, %51, %cst_28 [1] : vector<2x10xf32> to vector<2xf32>
    %53 = vector.shape_cast %52 : vector<2xf32> to vector<2x1xf32>
    %cst_29 = arith.constant 1.000000e+01 : f32
    %54 = vector.broadcast %cst_29 : f32 to vector<2x1xf32>
    %55 = arith.divf %53, %54 : vector<2x1xf32>
    %56 = vector.broadcast %48 : vector<2x1xf32> to vector<2x10xf32>
    %57 = arith.subf %42, %56 : vector<2x10xf32>
    %cst_30 = arith.constant 9.99999974E-6 : f32
    %58 = vector.broadcast %cst_30 : f32 to vector<2x1xf32>
    %59 = arith.addf %55, %58 : vector<2x1xf32>
    %60 = math.rsqrt %59 : vector<2x1xf32>
    %61 = vector.broadcast %60 : vector<2x1xf32> to vector<2x10xf32>
    %62 = arith.mulf %57, %61 : vector<2x10xf32>
    %63 = vector.broadcast %43 : vector<1x10xf32> to vector<2x10xf32>
    %64 = arith.mulf %62, %63 : vector<2x10xf32>
    %65 = vector.broadcast %44 : vector<1x10xf32> to vector<2x10xf32>
    %66 = arith.addf %64, %65 : vector<2x10xf32>
    %cst_31 = arith.constant 5.000000e-01 : f32
    %67 = vector.broadcast %cst_31 : f32 to vector<2x10xf32>
    %68 = arith.mulf %67, %66 : vector<2x10xf32>
    %cst_32 = arith.constant 0.707106769 : f32
    %69 = vector.broadcast %cst_32 : f32 to vector<2x10xf32>
    %70 = arith.mulf %66, %69 : vector<2x10xf32>
    %71 = math.erf %70 : vector<2x10xf32>
    %cst_33 = arith.constant 1.000000e+00 : f32
    %72 = vector.broadcast %cst_33 : f32 to vector<2x10xf32>
    %73 = arith.addf %72, %71 : vector<2x10xf32>
    %74 = arith.mulf %68, %73 : vector<2x10xf32>
    %c0_34 = arith.constant 0 : index
    %c0_35 = arith.constant 0 : index
    %75 = vector.load %arg9[%c0_34, %c0_35] : memref<10x2xf32, #tpu.memory_space<vmem>>, vector<10x2xf32>
    %cst_36 = arith.constant dense<0.000000e+00> : vector<2x2xf32>
    %76 = tpu.matmul %74, %75, %cst_36 {dimension_numbers = #tpu.dot_dimension_numbers<[1], [0], [0], [1], [0, 0, 1, 1], [], []>} : vector<2x10xf32>, vector<10x2xf32>, vector<2x2xf32> -> vector<2x2xf32>
    %c0_37 = arith.constant 0 : index
    %c0_38 = arith.constant 0 : index
    %77 = vector.load %arg10[%c0_37, %c0_38] : memref<1x2xf32, #tpu.memory_space<vmem>>, vector<1x2xf32>
    %78 = vector.broadcast %77 : vector<1x2xf32> to vector<2x2xf32>
    %79 = arith.addf %76, %78 : vector<2x2xf32>
    %c0_39 = arith.constant 0 : index
    %c0_40 = arith.constant 0 : index
    %80 = vector.load %arg11[%c0_39, %c0_40] : memref<2x2xf32, #tpu.memory_space<vmem>>, vector<2x2xf32>
    tpu.vector_store %arg11[%c0_39, %c0_40], %79 {strides = array<i32>} : memref<2x2xf32, #tpu.memory_space<vmem>>, vector<2x2xf32>,
    return
  }
}

</mosaic_0001>

<bundles_post_ra>
// kernel: tpu_custom_call.1
= control target key start
LH: loop header
LB: loop body
LE: loop exit
PB: predicated region body
PF: predicated region fallthrough
CT: control target
= control target key end

     0   :  { %s977_s0 = inlined_call_operand.vmem [shape: f32[2,256], index: 0, kind: input, shape index: {}]   ;;  %s978_s1 = inlined_call_operand.vmem [shape: f32[256,160], index: 1, kind: input, shape index: {}]   ;;  %s979_s2 = inlined_call_operand.vmem [shape: f32[1,160], index: 2, kind: input, shape index: {}]   ;;  %s980_s3 = inlined_call_operand.vmem [shape: f32[1,160], index: 3, kind: input, shape index: {}]   ;;  %s981_s4 = inlined_call_operand.vmem [shape: f32[1,160], index: 4, kind: input, shape index: {}]   ;;  %s982_s5 = inlined_call_operand.vmem [shape: f32[160,10], index: 5, kind: input, shape index: {}]   ;;  %s983_s6 = inlined_call_operand.vmem [shape: f32[1,10], index: 6, kind: input, shape index: {}]   ;;  %s984_s7 = inlined_call_operand.vmem [shape: f32[1,10], index: 7, kind: input, shape index: {}]   ;;  %s985_s8 = inlined_call_operand.vmem [shape: f32[1,10], index: 8, kind: input, shape index: {}]   ;;  %s986_s9 = inlined_call_operand.vmem [shape: f32[10,2], index: 9, kind: input, shape index: {}]   ;;  %s987_s10 = inlined_call_operand.vmem [shape: f32[1,2], index: 10, kind: input, shape index: {}]   ;;  %s988_s11 = inlined_call_operand.hbm [shape: f32[2,2], index: 11, kind: output, shape index: {}]  }
   0x1   :  { %v71_v0 = vld [vmem:[%s978_s1 + $0xf8] sm:$0xff]  ;;  %v69_v1 = vld [vmem:[%s978_s1 + $0xe8] sm:$0xff]  ;;  %v70_v4 = vld [vmem:[%s978_s1 + $0xf0] sm:$0xff] }
   0x2   :  { %v103_v2 = vld [vmem:[%s978_s1 + $0x1f8] sm:$0xff]  ;;  %156 = vmatpush.msra.mxu2 %v71_v0  ;;  %v101_v3 = vld [vmem:[%s978_s1 + $0x1e8] sm:$0xff]  ;;  %116 = vmatpush.msra.mxu0 %v70_v4  ;;  %v68_v7 = vld [vmem:[%s978_s1 + $0xe0] sm:$0xff] }
   0x3   :  { %176 = vmatpush.msra.mxu3 %v103_v2  ;;  %v67_v5 = vld [vmem:[%s978_s1 + $0xd8] sm:$0xff]  ;;  %v65_v8 = vld [vmem:[%s978_s1 + $0xc8] sm:$0xff]  ;;  %v102_v9 = vld [vmem:[%s978_s1 + $0x1f0] sm:$0xff] }
   0x4   :  { %v99_v6 = vld [vmem:[%s978_s1 + $0x1d8] sm:$0xff]  ;;  %157 = vmatpush.msra.mxu2 %v69_v1  ;;  %117 = vmatpush.msra.mxu0 %v68_v7  ;;  %v97_v10 = vld [vmem:[%s978_s1 + $0x1c8] sm:$0xff]  ;;  %v66_v11 = vld [vmem:[%s978_s1 + $0xd0] sm:$0xff] }
   0x5   :  { %177 = vmatpush.msra.mxu3 %v101_v3  ;;  %136 = vmatpush.msra.mxu1 %v102_v9  ;;  %v100_v12 = vld [vmem:[%s978_s1 + $0x1e0] sm:$0xff]  ;;  %v98_v14 = vld [vmem:[%s978_s1 + $0x1d0] sm:$0xff]  ;;  %v63_v15 = vld [vmem:[%s978_s1 + $0xb8] sm:$0xff] }
   0x6   :  { %158 = vmatpush.msra.mxu2 %v67_v5  ;;  %v64_v13 = vld [vmem:[%s978_s1 + $0xc0] sm:$0xff]  ;;  %118 = vmatpush.msra.mxu0 %v66_v11  ;;  %v95_v16 = vld [vmem:[%s978_s1 + $0x1b8] sm:$0xff]  ;;  %v62_v17 = vld [vmem:[%s978_s1 + $0xb0] sm:$0xff] }
   0x7   :  { %178 = vmatpush.msra.mxu3 %v99_v6  ;;  %137 = vmatpush.msra.mxu1 %v100_v12  ;;  %v96_v18 = vld [vmem:[%s978_s1 + $0x1c0] sm:$0xff]  ;;  %v61_v19 = vld [vmem:[%s978_s1 + $0xa8] sm:$0xff]  ;;  %v94_v22 = vld [vmem:[%s978_s1 + $0x1b0] sm:$0xff] }
   0x8   :  { %159 = vmatpush.msra.mxu2 %v65_v8  ;;  %119 = vmatpush.msra.mxu0 %v64_v13  ;;  %v93_v20 = vld [vmem:[%s978_s1 + $0x1a8] sm:$0xff]  ;;  %v60_v21 = vld [vmem:[%s978_s1 + $0xa0] sm:$0xff]  ;;  %v59_v23 = vld [vmem:[%s978_s1 + $0x98] sm:$0xff] }
   0x9   :  { %179 = vmatpush.msra.mxu3 %v97_v10  ;;  %138 = vmatpush.msra.mxu1 %v98_v14  ;;  %v91_v24 = vld [vmem:[%s978_s1 + $0x198] sm:$0xff]  ;;  %v58_v25 = vld [vmem:[%s978_s1 + $0x90] sm:$0xff]  ;;  %v92_v26 = vld [vmem:[%s978_s1 + $0x1a0] sm:$0xff] }
   0xa   :  { %160 = vmatpush.msra.mxu2 %v63_v15  ;;  %120 = vmatpush.msra.mxu0 %v62_v17  ;;  %v57_v27 = vld [vmem:[%s978_s1 + $0x88] sm:$0xff]  ;;  %v56_v29 = vld [vmem:[%s978_s1 + $0x80] sm:$0xff]  ;;  %v90_v30 = vld [vmem:[%s978_s1 + $0x190] sm:$0xff] }
   0xb   :  { %180 = vmatpush.msra.mxu3 %v95_v16  ;;  %139 = vmatpush.msra.mxu1 %v96_v18  ;;  %v89_v28 = vld [vmem:[%s978_s1 + $0x188] sm:$0xff]  ;;  %v55_v31 = vld [vmem:[%s978_s1 + $0x78] sm:$0xff]  ;;  %v54_v33 = vld [vmem:[%s978_s1 + $0x70] sm:$0xff] }
   0xc   :  { %161 = vmatpush.msra.mxu2 %v61_v19  ;;  %121 = vmatpush.msra.mxu0 %v60_v21  ;;  %v87_v32 = vld [vmem:[%s978_s1 + $0x178] sm:$0xff]  ;;  %v88_v34 = vld [vmem:[%s978_s1 + $0x180] sm:$0xff]  ;;  %v53_v35 = vld [vmem:[%s978_s1 + $0x68] sm:$0xff] }
   0xd   :  { %181 = vmatpush.msra.mxu3 %v93_v20  ;;  %140 = vmatpush.msra.mxu1 %v94_v22  ;;  %v85_v36 = vld [vmem:[%s978_s1 + $0x168] sm:$0xff]  ;;  %v52_v37 = vld [vmem:[%s978_s1 + $0x60] sm:$0xff]  ;;  %v86_v38 = vld [vmem:[%s978_s1 + $0x170] sm:$0xff] }
   0xe   :  { %162 = vmatpush.msra.mxu2 %v59_v23  ;;  %122 = vmatpush.msra.mxu0 %v58_v25  ;;  %v51_v39 = vld [vmem:[%s978_s1 + $0x58] sm:$0xff]  ;;  %v39_v41 = vld [vmem:[%s977_s0] sm:$0xf]  ;;  %v49_v42 = vld [vmem:[%s978_s1 + $0x48] sm:$0xff] }
   0xf   :  { %182 = vmatpush.msra.mxu3 %v91_v24  ;;  %141 = vmatpush.msra.mxu1 %v92_v26  ;;  %v83_v40 = vld [vmem:[%s978_s1 + $0x158] sm:$0xff]  ;;  %v50_v43 = vld [vmem:[%s978_s1 + $0x50] sm:$0xff]  ;;  %v84_v44 = vld [vmem:[%s978_s1 + $0x160] sm:$0xff]  ;;  %111 = vst [vmem:[#allocation1] ss:$4 sm:$0xff] %v39_v41 }
  0x10   :  { %163 = vmatpush.msra.mxu2 %v57_v27  ;;  %123 = vmatpush.msra.mxu0 %v56_v29  ;;  %v47_v45 = vld [vmem:[%s978_s1 + $0x38] sm:$0xff]  ;;  %v81_v46 = vld [vmem:[%s978_s1 + $0x148] sm:$0xff]  ;;  %v48_v48 = vld [vmem:[%s978_s1 + $0x40] sm:$0xff] }
  0x11   :  { %183 = vmatpush.msra.mxu3 %v89_v28  ;;  %142 = vmatpush.msra.mxu1 %v90_v30  ;;  %v79_v47 = vld [vmem:[%s978_s1 + $0x138] sm:$0xff]  ;;  %v82_v49 = vld [vmem:[%s978_s1 + $0x150] sm:$0xff]  ;;  %v80_v51 = vld [vmem:[%s978_s1 + $0x140] sm:$0xff] }
  0x12   :  { %164 = vmatpush.msra.mxu2 %v55_v31  ;;  %124 = vmatpush.msra.mxu0 %v54_v33  ;;  %v46_v50 = vld [vmem:[%s978_s1 + $0x30] sm:$0xff] }
  0x13   :  { %184 = vmatpush.msra.mxu3 %v87_v32  ;;  %143 = vmatpush.msra.mxu1 %v88_v34 }
  0x14   :  { %165 = vmatpush.msra.mxu2 %v53_v35  ;;  %125 = vmatpush.msra.mxu0 %v52_v37 }
  0x15   :  { %185 = vmatpush.msra.mxu3 %v85_v36  ;;  %144 = vmatpush.msra.mxu1 %v86_v38 }
  0x16   :  { %166 = vmatpush.msra.mxu2 %v51_v39  ;;  %126 = vmatpush.msra.mxu0 %v50_v43 }
  0x17   :  { %186 = vmatpush.msra.mxu3 %v83_v40  ;;  %145 = vmatpush.msra.mxu1 %v84_v44 }
  0x18   :  { %167 = vmatpush.msra.mxu2 %v49_v42 }
  0x19   :  { %187 = vmatpush.msra.mxu3 %v81_v46 }
  0x1a   :  { %16 = vsyncpa [#allocation3], 0  ;;  %v45_v52 = vld [vmem:[%s978_s1 + $0x28] sm:$0xff]  ;;  %127 = vmatpush.msra.mxu0 %v48_v48  ;;  %146 = vmatpush.msra.mxu1 %v82_v49  ;;  %v44_v54 = vld [vmem:[%s978_s1 + $0x20] sm:$0xff]  ;;  %vm198_vm0 = vcmask 1041408   ;;  %vm200_vm1 = vcmask 254976  }
  0x1b   :  { %v77_v53 = vld [vmem:[%s978_s1 + $0x128] sm:$0xff]  ;;  %168 = vmatpush.msra.mxu2 %v47_v45  ;;  %188 = vmatpush.msra.mxu3 %v79_v47  ;;  %v78_v55 = vld [vmem:[%s978_s1 + $0x130] sm:$0xff]  ;;  %v43_v56 = vld [vmem:[%s978_s1 + $0x18] sm:$0xff]  ;;  %v594_v17 = vmov 160.0   ;;  %vm362_vm14 = vcmask 261120   ;;  %vm408_vm15 = vcmask 74752  }
  0x1c   :  { %128 = vmatpush.msra.mxu0 %v46_v50  ;;  %147 = vmatpush.msra.mxu1 %v80_v51  ;;  %v75_v57 = vld [vmem:[%s978_s1 + $0x118] sm:$0xff]  ;;  %v42_v58 = vld [vmem:[%s978_s1 + $0x10] sm:$0xff]  ;;  %v76_v59 = vld [vmem:[%s978_s1 + $0x120] sm:$0xff]  ;;  %554 = vrcp.f32 %v594_v17  ;;  %s596_s16 = smov [#allocation2]   ;;  %s532_s20 = sshll.u32 %s988_s11, 4  ;;  %s533_s20 = int_to_ptr.hbm [resolvable:$true] %s532_s20 }
  0x1d   :  { %169 = vmatpush.msra.mxu2 %v45_v52  ;;  %189 = vmatpush.msra.mxu3 %v77_v53  ;;  %v41_v60 = vld [vmem:[%s978_s1 + $0x8] sm:$0xff]  ;;  %v112_v62 = vld.sshfl [vmem:[#allocation1] sm:$0xff pattern:$0x73625140]  ;;  %v74_v1 = vld [vmem:[%s978_s1 + $0x110] sm:$0xff]  ;;  %s530_s17 = sshll.u32 %s596_s16, 4  ;;  %s531_s17 = int_to_ptr.vmem [resolvable:$true] %s530_s17 }
  0x1e   :  { %129 = vmatpush.msra.mxu0 %v44_v54  ;;  %148 = vmatpush.msra.mxu1 %v78_v55  ;;  %v73_v61 = vld [vmem:[%s978_s1 + $0x108] sm:$0xff]  ;;  %v40_v0 = vld [vmem:[%s978_s1] sm:$0xff]  ;;  %v353_v33 = vld [vmem:[%s982_s5 + $0x78] sm:$0xff] }
  0x1f   :  { %170 = vmatpush.msra.mxu2 %v43_v56  ;;  %190 = vmatpush.msra.mxu3 %v75_v57  ;;  %v113_v63 = vld.sshfl [vmem:[#allocation1 + $0x8] sm:$0xff pattern:$0x73625140]  ;;  %v72_v2 = vld [vmem:[%s978_s1 + $0x100] sm:$0xff]  ;;  %v352_v34 = vld [vmem:[%s982_s5 + $0x70] sm:$0xff] }
  0x20   :  { %130 = vmatpush.msra.mxu0 %v42_v58  ;;  %149 = vmatpush.msra.mxu1 %v76_v59  ;;  %v104_v3 = vld [vmem:[%s979_s2] sm:$0x3]  ;;  %v351_v35 = vld [vmem:[%s982_s5 + $0x68] sm:$0xff]  ;;  %v357_v37 = vld [vmem:[%s982_s5 + $0x98] sm:$0xff] }
  0x21   :  { %171 = vmatpush.msra.mxu2 %v41_v60  ;;  %191 = vmatpush.msra.mxu3 %v73_v61  ;;  %v106_v4 = vperm.slane %v104_v3, 0  ;;  %v107_v7 = vperm.slane %v104_v3, 1  ;;  %v350_v36 = vld [vmem:[%s982_s5 + $0x60] sm:$0xff]  ;;  %v356_v38 = vld [vmem:[%s982_s5 + $0x90] sm:$0xff]  ;;  %v349_v39 = vld [vmem:[%s982_s5 + $0x58] sm:$0xff] }
  0x22   :  { %172 = vmatmul.f32.vlgmr.msra.gmra.mxu2 %v112_v62  ;;  %192 = vmatmul.f32.vlgmr.msra.gmra.mxu3 %v113_v63  ;;  %v555_v18 = vpop.eup %554  ;;  %v355_v40 = vld [vmem:[%s982_s5 + $0x88] sm:$0xff]  ;;  %v348_v43 = vld [vmem:[%s982_s5 + $0x50] sm:$0xff]  ;;  %v354_v44 = vld [vmem:[%s982_s5 + $0x80] sm:$0xff] }
  0x23   :  { %131 = vmatpush.msra.mxu0 %v40_v0  ;;  %150 = vmatpush.msra.mxu1 %v74_v1  ;;  %v206_v19 = vmul.f32 160.0, %v555_v18  ;;  %vm210_vm2 = vweird.f32 %v555_v18  ;;  %v347_v46 = vld [vmem:[%s982_s5 + $0x48] sm:$0xff]  ;;  %v346_v47 = vld [vmem:[%s982_s5 + $0x40] sm:$0xff]  ;;  %v345_v48 = vld [vmem:[%s982_s5 + $0x38] sm:$0xff] }
  0x24   :  { %132 = vmatmul.f32.vlgmr.msra.gmra.mxu0 %v112_v62  ;;  %v344_v49 = vld [vmem:[%s982_s5 + $0x30] sm:$0xff]  ;;  %v343_v51 = vld [vmem:[%s982_s5 + $0x28] sm:$0xff]  ;;  %v342_v53 = vld [vmem:[%s982_s5 + $0x20] sm:$0xff] }
  0x25   :  { %151 = vmatpush.msra.mxu1 %v72_v2  ;;  %v207_v20 = vsub.f32 1.0, %v206_v19  ;;  %366 = vmatpush.msrb.mxu0 %v353_v33  ;;  %v341_v55 = vld [vmem:[%s982_s5 + $0x18] sm:$0xff]  ;;  %v340_v57 = vld [vmem:[%s982_s5 + $0x10] sm:$0xff]  ;;  %v196_v58 = vld [vmem:[%s980_s3] sm:$0x3] }
  0x26   :  { %152 = vmatmul.f32.vlgmr.msra.gmra.mxu1 %v113_v63  ;;  %v339_v60 = vld [vmem:[%s982_s5 + $0x8] sm:$0xff]  ;;  %v197_v62 = vld [vmem:[%s981_s4] sm:$0x3]  ;;  %v238_v63 = vperm.slane %v196_v58, 1  ;;  %v237_v1 = vperm.slane %v196_v58, 0 }
  0x27   :  { %v208_v21 = vmul.f32 %v555_v18, %v207_v20  ;;  %367 = vmatpush.msrb.mxu0 %v352_v34  ;;  %398 = vmatpush.msrb.mxu1 %v357_v37  ;;  %v338_v0 = vld [vmem:[%s982_s5] sm:$0xff] }
  0x29   :  { %v209_v22 = vadd.f32 %v555_v18, %v208_v21  ;;  %368 = vmatpush.msrb.mxu0 %v351_v35  ;;  %399 = vmatpush.msrb.mxu1 %v356_v38 }
  0x2b   :  { %v211_v23 = vsel %vm210_vm2, %v555_v18, %v209_v22  ;;  %369 = vmatpush.msrb.mxu0 %v350_v36  ;;  %400 = vmatpush.msrb.mxu1 %v355_v40 }
  0x2d   :  { %370 = vmatpush.msrb.mxu0 %v349_v39  ;;  %401 = vmatpush.msrb.mxu1 %v354_v44 }
  0x2f   :  { %371 = vmatpush.msrb.mxu0 %v348_v43 }
  0x31   :  { %372 = vmatpush.msrb.mxu0 %v347_v46 }
  0x33   :  { %373 = vmatpush.msrb.mxu0 %v346_v47 }
  0x35   :  { %374 = vmatpush.msrb.mxu0 %v345_v48 }
  0x37   :  { %375 = vmatpush.msrb.mxu0 %v344_v49 }
  0x39   :  { %376 = vmatpush.msrb.mxu0 %v343_v51 }
  0x3b   :  { %377 = vmatpush.msrb.mxu0 %v342_v53 }
  0x3d   :  { %378 = vmatpush.msrb.mxu0 %v341_v55 }
  0x3f   :  { %379 = vmatpush.msrb.mxu0 %v340_v57 }
  0x41   :  { %380 = vmatpush.msrb.mxu0 %v339_v60 }
  0x43   :  { %381 = vmatpush.msrb.mxu0 %v338_v0 }
  0xa1   :  { %v133_v5 = vpop.f32.mrf.mxu0 }
  0xa2   :  { %v134_v6 = vadd.f32 %v133_v5, %v106_v4  ;;  %v244_v5 = vperm.slane %v197_v62, 0 }
  0xa3   :  { %v153_v8 = vpop.f32.mrf.mxu1 }
  0xa4   :  { %v154_v9 = vadd.f32 %v153_v8, %v134_v6  ;;  %v245_v6 = vperm.slane %v197_v62, 1 }
  0xa5   :  { %v173_v10 = vpop.f32.mrf.mxu2  ;;  %v193_v11 = vpop.f32.mrf.mxu3 }
  0xa6   :  { %v174_v12 = vadd.f32 %v173_v10, %v107_v7  ;;  %v199_v14 = vsel %vm198_vm0, %v154_v9, 0.0 }
  0xa8   :  { %v194_v13 = vadd.f32 %v193_v11, %v174_v12 }
  0xaa   :  { %v201_v15 = vsel %vm200_vm1, %v194_v13, 0.0 }
  0xab   :  { %v202_v16 = vadd.f32 %v201_v15, %v199_v14 }
  0xad   :  { %203 = vadd.xlane.f32.xlu0 %v202_v16 }
 0x120   :  { %v204_v24 = vpop.xlane.xlu0 %203 }
 0x121   :  { %v212_v25 = vmul.f32 %v211_v23, %v204_v24 }
 0x123   :  { %v857_v26 = vsub.f32 %v154_v9, %v212_v25  ;;  %v859_v27 = vsub.f32 %v194_v13, %v212_v25 }
 0x125   :  { %v215_v28 = vmul.f32 %v857_v26, %v857_v26  ;;  %v216_v29 = vmul.f32 %v859_v27, %v859_v27 }
 0x127   :  { %v217_v30 = vsel %vm198_vm0, %v215_v28, 0.0  ;;  %v218_v31 = vsel %vm200_vm1, %v216_v29, 0.0 }
 0x128   :  { %v219_v32 = vadd.f32 %v218_v31, %v217_v30 }
 0x12a   :  { %220 = vadd.xlane.f32.xlu0 %v219_v32 }
 0x19d   :  { %v221_v41 = vpop.xlane.xlu0 %220 }
 0x19e   :  { %v222_v42 = vmul.f32 %v221_v41, %v211_v23 }
 0x1a0   :  { %v223_v45 = vadd.f32 1e-05, %v222_v42 }
 0x1a2   :  { %556 = vrsqrt.f32 %v223_v45  ;;  %vm230_vm4 = vweird.f32 %v223_v45 }
 0x1a8   :  { %v557_v50 = vpop.eup %556 }
 0x1a9   :  { %v225_v52 = vmul.f32 %v557_v50, %v223_v45  ;;  %vm231_vm3 = vweird.f32 %v557_v50 }
 0x1aa   :  { %vm232_vm5 = vmor %vm230_vm4, %vm231_vm3 }
 0x1ab   :  { %v226_v54 = vmul.f32 %v557_v50, %v225_v52 }
 0x1ad   :  { %v227_v56 = vmul.f32 0.5, %v226_v54 }
 0x1af   :  { %v228_v59 = vsub.f32 1.5, %v227_v56 }
 0x1b1   :  { %v229_v61 = vmul.f32 %v557_v50, %v228_v59 }
 0x1b3   :  { %v233_v2 = vsel %vm232_vm5, %v557_v50, %v229_v61 }
 0x1b4   :  { %v234_v3 = vmul.f32 %v233_v2, %v857_v26  ;;  %v235_v4 = vmul.f32 %v233_v2, %v859_v27 }
 0x1b6   :  { %v242_v7 = vmul.f32 %v238_v63, %v235_v4  ;;  %v241_v8 = vmul.f32 %v237_v1, %v234_v3 }
 0x1b8   :  { %v935_v9 = vadd.f32 %v244_v5, %v241_v8  ;;  %v937_v10 = vadd.f32 %v245_v6, %v242_v7 }
 0x1ba   :  { %v940_v11 = vmul.f32 0.70710677, %v935_v9  ;;  %v943_v12 = vmul.f32 0.70710677, %v937_v10 }
 0x1bc   :  { %v254_v13 = vmul.f32 %v940_v11, %v940_v11  ;;  %v294_v14 = vmul.f32 %v943_v12, %v943_v12 }
 0x1be   :  { %v255_v15 = vmin.f32 %v254_v13, 16.0  ;;  %v295_v16 = vmin.f32 %v294_v14, 16.0 }
 0x1c0   :  { %v256_v17 = vmul.f32 2.1237322e-06, %v255_v15  ;;  %v267_v18 = vmul.f32 3.8918573e-05, %v255_v15  ;;  %v296_v19 = vmul.f32 2.1237322e-06, %v295_v16 }
 0x1c1   :  { %v307_v20 = vmul.f32 3.8918573e-05, %v295_v16 }
 0x1c2   :  { %v257_v21 = vadd.f32 0.00028619796, %v256_v17  ;;  %v268_v22 = vadd.f32 0.001143296, %v267_v18  ;;  %v297_v23 = vadd.f32 0.00028619796, %v296_v19 }
 0x1c3   :  { %v308_v24 = vadd.f32 0.001143296, %v307_v20 }
 0x1c4   :  { %v258_v25 = vmul.f32 %v257_v21, %v255_v15  ;;  %v269_v26 = vmul.f32 %v268_v22, %v255_v15  ;;  %v298_v27 = vmul.f32 %v297_v23, %v295_v16  ;;  %v250_v23 = vmul.f32 0.5, %v935_v9 }
 0x1c5   :  { %v309_v28 = vmul.f32 %v308_v24, %v295_v16 }
 0x1c6   :  { %v259_v29 = vadd.f32 0.0036580483, %v258_v25  ;;  %v270_v30 = vadd.f32 0.014752088, %v269_v26  ;;  %v299_v33 = vadd.f32 0.0036580483, %v298_v27 }
 0x1c7   :  { %v310_v31 = vadd.f32 0.014752088, %v309_v28  ;;  %v251_v25 = vmul.f32 0.5, %v937_v10 }
 0x1c8   :  { %v271_v32 = vmul.f32 %v270_v30, %v255_v15  ;;  %v260_v35 = vmul.f32 %v259_v29, %v255_v15  ;;  %v300_v39 = vmul.f32 %v299_v33, %v295_v16 }
 0x1c9   :  { %v311_v34 = vmul.f32 %v310_v31, %v295_v16 }
 0x1ca   :  { %v272_v36 = vadd.f32 0.112945676, %v271_v32  ;;  %v261_v41 = vadd.f32 0.05243302, %v260_v35  ;;  %v301_v45 = vadd.f32 0.05243302, %v300_v39 }
 0x1cb   :  { %v312_v37 = vadd.f32 0.112945676, %v311_v34  ;;  %v595_v32 = vmov 10.0  }
 0x1cc   :  { %v273_v38 = vmul.f32 %v272_v36, %v255_v15  ;;  %v262_v47 = vmul.f32 %v261_v41, %v255_v15  ;;  %v302_v50 = vmul.f32 %v301_v45, %v295_v16 }
 0x1cd   :  { %v313_v40 = vmul.f32 %v312_v37, %v295_v16 }
 0x1ce   :  { %v274_v42 = vadd.f32 0.4994258, %v273_v38  ;;  %v263_v51 = vadd.f32 0.18741608, %v262_v47  ;;  %v303_v52 = vadd.f32 0.18741608, %v302_v50 }
 0x1cf   :  { %v314_v43 = vadd.f32 0.4994258, %v313_v40 }
 0x1d0   :  { %v275_v44 = vmul.f32 %v274_v42, %v255_v15  ;;  %v264_v54 = vmul.f32 %v263_v51, %v255_v15  ;;  %v304_v57 = vmul.f32 %v303_v52, %v295_v16 }
 0x1d1   :  { %v315_v46 = vmul.f32 %v314_v43, %v295_v16  ;;  %v491_v43 = vld [vmem:[%s986_s9 + $0x8] sm:$0x3] }
 0x1d2   :  { %v276_v48 = vadd.f32 1.0, %v275_v44  ;;  %v265_v60 = vadd.f32 1.1283791, %v264_v54  ;;  %v305_v2 = vadd.f32 1.1283791, %v304_v57  ;;  %v490_v44 = vld [vmem:[%s986_s9] sm:$0xff]  ;;  %545 = vmatpush.msk.msrb.mxu2 %vm198_vm0, %v491_v43 }
 0x1d3   :  { %v316_v49 = vadd.f32 1.0, %v315_v46  ;;  %v551_v54 = vld [vmem:[%s984_s7] ss:$0 sm:$0xff] }
 0x1d4   :  { %558 = vrcp.f32 %v276_v48  ;;  %v288_v61 = vand.u32 2147483648, %v276_v48  ;;  %v286_v0 = vand.u32 2147483647, %v276_v48  ;;  %vm282_vm8 = vweird.f32 %v276_v48  ;;  %518 = vmatpush.msrb.mxu2 %v490_v44  ;;  %v552_v57 = vld [vmem:[%s985_s8] ss:$0 sm:$0xff] }
 0x1d5   :  { %560 = vrcp.f32 %v316_v49  ;;  %v328_v1 = vand.u32 2147483648, %v316_v49  ;;  %v326_v4 = vand.u32 2147483647, %v316_v49  ;;  %vm322_vm10 = vweird.f32 %v316_v49 }
 0x1d6   :  { %v289_v6 = vor.u32 1.1754944e-38, %v288_v61  ;;  %v266_v8 = vmul.f32 %v265_v60, %v940_v11  ;;  %vm287_vm11 = vcmp.eq.f32.partialorder %v286_v0, 8.507059e+37  ;;  %v306_v16 = vmul.f32 %v305_v2, %v943_v12  ;;  %v550_v12 = vld [vmem:[%s983_s6] ss:$0 sm:$0xff] }
 0x1d7   :  { %v329_v14 = vor.u32 1.1754944e-38, %v328_v1  ;;  %vm327_vm13 = vcmp.eq.f32.partialorder %v326_v4, 8.507059e+37  ;;  %562 = vrcp.f32 %v595_v32 }
 0x1da   :  { %v559_v53 = vpop.eup %558 }
 0x1db   :  { %v561_v55 = vpop.eup %560  ;;  %v278_v56 = vmul.f32 %v559_v53, %v276_v48  ;;  %vm283_vm6 = vweird.f32 %v559_v53 }
 0x1dc   :  { %v318_v58 = vmul.f32 %v561_v55, %v316_v49  ;;  %vm323_vm7 = vweird.f32 %v561_v55  ;;  %vm284_vm9 = vmor %vm282_vm8, %vm283_vm6  ;;  %vm496_vm8 = vcmask 80896  }
 0x1dd   :  { %v279_v59 = vsub.f32 1.0, %v278_v56  ;;  %vm324_vm12 = vmor %vm322_vm10, %vm323_vm7  ;;  %v563_v10 = vpop.eup %562 }
 0x1de   :  { %v319_v62 = vsub.f32 1.0, %v318_v58  ;;  %v413_v33 = vmul.f32 10.0, %v563_v10  ;;  %vm417_vm1 = vweird.f32 %v563_v10 }
 0x1df   :  { %v280_v63 = vmul.f32 %v559_v53, %v279_v59 }
 0x1e0   :  { %v320_v3 = vmul.f32 %v561_v55, %v319_v62  ;;  %v414_v34 = vsub.f32 1.0, %v413_v33 }
 0x1e1   :  { %v281_v5 = vadd.f32 %v559_v53, %v280_v63 }
 0x1e2   :  { %v321_v7 = vadd.f32 %v561_v55, %v320_v3  ;;  %v415_v35 = vmul.f32 %v563_v10, %v414_v34 }
 0x1e3   :  { %v285_v13 = vsel %vm284_vm9, %v559_v53, %v281_v5  ;;  %vm523_vm9 = vcmask 9216  }
 0x1e4   :  { %v290_v15 = vsel %vm287_vm11, %v289_v6, %v285_v13  ;;  %v325_v17 = vsel %vm324_vm12, %v561_v55, %v321_v7  ;;  %v416_v36 = vadd.f32 %v563_v10, %v415_v35  ;;  %v553_v35 = vld [vmem:[%s987_s10] ss:$0 sm:$0xff] }
 0x1e5   :  { %v291_v18 = vmul.f32 %v290_v15, %v266_v8  ;;  %v330_v19 = vsel %vm327_vm13, %v329_v14, %v325_v17 }
 0x1e6   :  { %v331_v20 = vmul.f32 %v330_v19, %v306_v16  ;;  %v418_v37 = vsel %vm417_vm1, %v563_v10, %v416_v36 }
 0x1e7   :  { %v541_v21 = vclamps-f32 %v291_v18, 1.0 }
 0x1e8   :  { %v542_v22 = vclamps-f32 %v331_v20, 1.0 }
 0x1e9   :  { %v334_v24 = vadd.f32 1.0, %v541_v21 }
 0x1ea   :  { %v335_v11 = vadd.f32 1.0, %v542_v22 }
 0x1eb   :  { %v336_v26 = vmul.f32 %v334_v24, %v250_v23 }
 0x1ec   :  { %v337_v27 = vmul.f32 %v335_v11, %v251_v25 }
 0x1ed   :  { %382 = vmatmul.f32.vlgmr.msrb.gmra.mxu0 %v336_v26 }
 0x1ee   :  { %543 = vmatmul.msk.f32.vlgmr.msrb.gmra.mxu1 %vm362_vm14, %v337_v27 }
 0x26a   :  { %v383_v28 = vpop.f32.mrf.mxu0 }
 0x26b   :  { %v384_v29 = vadd.f32 %v550_v12, %v383_v28  ;;  %v403_v30 = vpop.f32.mrf.mxu1 }
 0x26d   :  { %v404_v31 = vadd.f32 %v403_v30, %v384_v29 }
 0x26f   :  { %v409_v9 = vsel %vm408_vm15, %v404_v31, 0.0 }
 0x270   :  { %410 = vadd.xlane.f32.xlu1 %v409_v9 }
 0x2e3   :  { %v411_v38 = vpop.xlane.xlu1 %410 }
 0x2e4   :  { %v419_v39 = vmul.f32 %v418_v37, %v411_v38 }
 0x2e6   :  { %v420_v40 = vsub.f32 %v404_v31, %v419_v39 }
 0x2e8   :  { %v421_v41 = vmul.f32 %v420_v40, %v420_v40 }
 0x2ea   :  { %v422_v42 = vsel %vm408_vm15, %v421_v41, 0.0 }
 0x2eb   :  { %423 = vadd.xlane.f32.xlu1 %v422_v42 }
 0x35e   :  { %v424_v45 = vpop.xlane.xlu1 %423 }
 0x35f   :  { %v425_v46 = vmul.f32 %v424_v45, %v418_v37 }
 0x361   :  { %v426_v47 = vadd.f32 1e-05, %v425_v46 }
 0x363   :  { %564 = vrsqrt.f32 %v426_v47  ;;  %vm433_vm3 = vweird.f32 %v426_v47 }
 0x369   :  { %v565_v48 = vpop.eup %564 }
 0x36a   :  { %v428_v49 = vmul.f32 %v565_v48, %v426_v47  ;;  %vm434_vm2 = vweird.f32 %v565_v48 }
 0x36b   :  { %vm435_vm4 = vmor %vm433_vm3, %vm434_vm2 }
 0x36c   :  { %v429_v50 = vmul.f32 %v565_v48, %v428_v49 }
 0x36e   :  { %v430_v51 = vmul.f32 0.5, %v429_v50 }
 0x370   :  { %v431_v52 = vsub.f32 1.5, %v430_v51 }
 0x372   :  { %v432_v53 = vmul.f32 %v565_v48, %v431_v52 }
 0x374   :  { %v436_v55 = vsel %vm435_vm4, %v565_v48, %v432_v53 }
 0x375   :  { %v437_v56 = vmul.f32 %v436_v55, %v420_v40 }
 0x377   :  { %v441_v58 = vmul.f32 %v551_v54, %v437_v56 }
 0x379   :  { %v445_v59 = vadd.f32 %v552_v57, %v441_v58 }
 0x37b   :  { %v447_v60 = vmul.f32 0.70710677, %v445_v59  ;;  %v446_v10 = vmul.f32 0.5, %v445_v59 }
 0x37d   :  { %v448_v61 = vmul.f32 %v447_v60, %v447_v60 }
 0x37f   :  { %v449_v62 = vmin.f32 %v448_v61, 16.0 }
 0x381   :  { %v450_v63 = vmul.f32 2.1237322e-06, %v449_v62  ;;  %v461_v0 = vmul.f32 3.8918573e-05, %v449_v62 }
 0x383   :  { %v451_v1 = vadd.f32 0.00028619796, %v450_v63  ;;  %v462_v2 = vadd.f32 0.001143296, %v461_v0 }
 0x385   :  { %v452_v3 = vmul.f32 %v451_v1, %v449_v62  ;;  %v463_v4 = vmul.f32 %v462_v2, %v449_v62 }
 0x387   :  { %v464_v5 = vadd.f32 0.014752088, %v463_v4  ;;  %v453_v6 = vadd.f32 0.0036580483, %v452_v3 }
 0x389   :  { %v465_v7 = vmul.f32 %v464_v5, %v449_v62  ;;  %v454_v13 = vmul.f32 %v453_v6, %v449_v62 }
 0x38b   :  { %v466_v8 = vadd.f32 0.112945676, %v465_v7  ;;  %v455_v16 = vadd.f32 0.05243302, %v454_v13 }
 0x38d   :  { %v467_v14 = vmul.f32 %v466_v8, %v449_v62  ;;  %v456_v19 = vmul.f32 %v455_v16, %v449_v62 }
 0x38f   :  { %v468_v15 = vadd.f32 0.4994258, %v467_v14  ;;  %v457_v20 = vadd.f32 0.18741608, %v456_v19 }
 0x391   :  { %v469_v17 = vmul.f32 %v468_v15, %v449_v62  ;;  %v458_v22 = vmul.f32 %v457_v20, %v449_v62 }
 0x393   :  { %v470_v18 = vadd.f32 1.0, %v469_v17  ;;  %v459_v11 = vadd.f32 1.1283791, %v458_v22 }
 0x395   :  { %566 = vrcp.f32 %v470_v18  ;;  %v482_v25 = vand.u32 2147483648, %v470_v18  ;;  %v480_v27 = vand.u32 2147483647, %v470_v18  ;;  %vm476_vm5 = vweird.f32 %v470_v18 }
 0x396   :  { %v460_v29 = vmul.f32 %v459_v11, %v447_v60 }
 0x397   :  { %v483_v28 = vor.u32 1.1754944e-38, %v482_v25  ;;  %vm481_vm7 = vcmp.eq.f32.partialorder %v480_v27, 8.507059e+37 }
 0x39b   :  { %v567_v21 = vpop.eup %566 }
 0x39c   :  { %v472_v23 = vmul.f32 %v567_v21, %v470_v18  ;;  %vm477_vm0 = vweird.f32 %v567_v21 }
 0x39d   :  { %vm478_vm6 = vmor %vm476_vm5, %vm477_vm0 }
 0x39e   :  { %v473_v24 = vsub.f32 1.0, %v472_v23 }
 0x3a0   :  { %v474_v26 = vmul.f32 %v567_v21, %v473_v24 }
 0x3a2   :  { %v475_v12 = vadd.f32 %v567_v21, %v474_v26 }
 0x3a4   :  { %v479_v30 = vsel %vm478_vm6, %v567_v21, %v475_v12 }
 0x3a5   :  { %v484_v31 = vsel %vm481_vm7, %v483_v28, %v479_v30 }
 0x3a6   :  { %v485_v9 = vmul.f32 %v484_v31, %v460_v29 }
 0x3a8   :  { %v544_v32 = vclamps-f32 %v485_v9, 1.0 }
 0x3aa   :  { %v488_v33 = vadd.f32 1.0, %v544_v32 }
 0x3ac   :  { %v489_v34 = vmul.f32 %v488_v33, %v446_v10 }
 0x3ae   :  { %546 = vmatmul.msk.f32.vlgmr.msrb.gmra.mxu2 %vm496_vm8, %v489_v34 }
 0x431   :  { %v520_v36 = vpop.f32.mrf.mxu2 }
 0x432   :  { %v521_v37 = vadd.f32 %v553_v35, %v520_v36 }
 0x434   :  { %524 = vst.msk [vmem:[#allocation2] sm:$0x3] %vm523_vm9, %v521_v37 }
 0x435   :  { %535 = dma.vmem_to_hbm [thread:$0]  %s531_s17, 32, %s533_s20, [#allocation3]  }
 0x436   :  { %592 = dma.done.wait [#allocation3], 32  }
 0x437   :  { %593 = vsyncadd [#allocation3], 4294967264 }
 0x438   :  { %540 = vsyncpa [#allocation3], 1 }

</bundles_post_ra>
